<compile_context>
chip_gen: v7x
topology: tpu7x:2x2x1
jax: 0.10.0
libtpu: 0.0.40
codegen_flags: <defaults>
</compile_context>

<pallas_src>
import functools

import jax
import jax.numpy as jnp
from jax.experimental import pallas as pl
from jax.experimental.pallas import tpu as pltpu


def _bneck_kernel(H, W,
                  x_ref, w1_ref, b1_ref, w2_ref, b2_ref, w3_ref, b3_ref,
                  o_ref):
    """One batch element per grid step; conv1+bn1+relu, conv2(3x3)+bn2+relu,
    conv3+bn3, identity shortcut and final relu all fused (BN scales are
    pre-folded into the weights)."""
    N = H * W
    x = x_ref[0]                                             # (Cin, N) f32

    # --- conv1: 1x1 (BN1 scale folded into w1) + bias + ReLU ----------------
    h1 = jnp.dot(w1_ref[...], x, preferred_element_type=jnp.float32)
    h1 = jnp.maximum(h1 + b1_ref[...], 0.0)                  # (P, N)
    P = h1.shape[0]

    # Column-boundary masks generated in-kernel (no HBM mask inputs).
    # For dx = -1 taps the wrapped source column is W-1; for dx = +1 it is 0.
    col = jax.lax.broadcasted_iota(jnp.int32, (1, N), 1) % W
    h1_l = jnp.where(col == W - 1, 0.0, h1)                  # source, dx = -1
    h1_r = jnp.where(col == 0, 0.0, h1)                      # source, dx = +1

    def shift(a, d):
        # b[:, n] = a[:, n + d] for 0 <= n + d < N, else 0 (pure in-register,
        # zero-fill handles the top/bottom image rows).
        if d == 0:
            return a
        z = jnp.zeros((a.shape[0], abs(d)), a.dtype)
        if d > 0:
            return jnp.concatenate([a[:, d:], z], axis=1)
        return jnp.concatenate([z, a[:, :d]], axis=1)

    # --- conv2: 3x3, pad=1, stride=1 ---------------------------------------
    # Stack the 9 shifted taps along the channel axis and run ONE fat matmul
    # with K = 9*P instead of 9 skinny K = P dots.
    taps = []
    for dy in (-1, 0, 1):
        for dx in (-1, 0, 1):
            src = h1_l if dx == -1 else (h1_r if dx == 1 else h1)
            taps.append(shift(src, dy * W + dx))
    hs = jnp.concatenate(taps, axis=0)                       # (9P, N)

    h2 = jnp.dot(w2_ref[...], hs, preferred_element_type=jnp.float32)
    h2 = jnp.maximum(h2 + b2_ref[...], 0.0)                  # (P, N)

    # --- conv3: 1x1 (BN3 folded) + bias, identity shortcut, ReLU ------------
    h3 = jnp.dot(w3_ref[...], h2, preferred_element_type=jnp.float32)
    h3 = h3 + b3_ref[...]
    o_ref[0] = jnp.maximum(h3 + x, 0.0).astype(o_ref.dtype)


def bneck_forward(x_nchw, params):
    B, Cin, H, W = x_nchw.shape
    N = H * W
    P = params["w1"].shape[0]
    assert Cin == P, "identity shortcut requires in_planes == planes"

    # NCHW -> (B, C, N); no transpose needed, spatial axis becomes the lane dim.
    x_flat = x_nchw.reshape(B, Cin, N)

    kernel = functools.partial(_bneck_kernel, H, W)

    flops = 2 * B * N * (Cin * P + 9 * P * P + P * P)
    bytes_accessed = 4 * (B * Cin * N + B * P * N
                          + P * Cin + 9 * P * P + P * P + 3 * P)

    out_flat = pl.pallas_call(
        kernel,
        out_shape=jax.ShapeDtypeStruct((B, P, N), jnp.float32),
        grid=(B,),
        in_specs=[
            pl.BlockSpec((1, Cin, N), lambda b: (b, 0, 0)),   # x
            pl.BlockSpec((P, Cin), lambda b: (0, 0)),         # w1 (BN1 folded)
            pl.BlockSpec((P, 1), lambda b: (0, 0)),           # b1
            pl.BlockSpec((P, 9 * P), lambda b: (0, 0)),       # w2 (BN2 folded)
            pl.BlockSpec((P, 1), lambda b: (0, 0)),           # b2
            pl.BlockSpec((P, P), lambda b: (0, 0)),           # w3 (BN3 folded)
            pl.BlockSpec((P, 1), lambda b: (0, 0)),           # b3
        ],
        out_specs=pl.BlockSpec((1, P, N), lambda b: (b, 0, 0)),
        compiler_params=pltpu.CompilerParams(
            dimension_semantics=("parallel",)),
        cost_estimate=pl.CostEstimate(flops=flops, transcendentals=0,
                                      bytes_accessed=bytes_accessed),
    )(x_flat,
      params["w1"], params["b1"],
      params["w2"], params["b2"],
      params["w3"], params["b3"])

    # (B, P, N) -> NCHW
    return out_flat.reshape(B, P, H, W)


def init_params(key, in_planes, planes):
    """Deterministic synthetic params.  Kernel params have BatchNorm folded
    into the conv weights (scale) and per-channel biases; torch-layout params
    are returned separately for the reference."""
    ks = jax.random.split(key, 15)
    eps = 1e-5

    def bn_fold(kg, kb, km, kv, c):
        gamma = 1.0 + 0.1 * jax.random.normal(kg, (c,), jnp.float32)
        beta = 0.1 * jax.random.normal(kb, (c,), jnp.float32)
        mean = 0.1 * jax.random.normal(km, (c,), jnp.float32)
        var = jnp.abs(1.0 + 0.1 * jax.random.normal(kv, (c,), jnp.float32))
        scale = gamma / jnp.sqrt(var + eps)
        bias = beta - mean * scale
        return scale, bias

    P, Cin = planes, in_planes
    w1_t = 0.2 * jax.random.normal(ks[0], (P, Cin, 1, 1), jnp.float32)
    w2_t = 0.2 * jax.random.normal(ks[1], (P, P, 3, 3), jnp.float32)
    w3_t = 0.2 * jax.random.normal(ks[2], (P, P, 1, 1), jnp.float32)
    s1, b1 = bn_fold(ks[3], ks[4], ks[5], ks[6], P)
    s2, b2 = bn_fold(ks[7], ks[8], ks[9], ks[10], P)
    s3, b3 = bn_fold(ks[11], ks[12], ks[13], ks[14], P)

    # Fold BN scales into the weights (per output channel == rows here).
    w1f = w1_t[:, :, 0, 0] * s1[:, None]                                # (P, Cin)
    # (out, in, ky, kx) -> (out, ky, kx, in) -> (P, 9P); column = k*P + q
    w2f = jnp.transpose(w2_t, (0, 2, 3, 1)).reshape(P, 9 * P) * s2[:, None]
    w3f = w3_t[:, :, 0, 0] * s3[:, None]                                # (P, P)

    kernel_params = {
        "w1": w1f, "b1": b1.reshape(P, 1),
        "w2": w2f, "b2": b2.reshape(P, 1),
        "w3": w3f, "b3": b3.reshape(P, 1),
    }
    torch_params = (w1_t, s1, b1, w2_t, s2, b2, w3_t, s3, b3)
    return kernel_params, torch_params


def bneck_reference(x, w1_t, s1, b1, w2_t, s2, b2, w3_t, s3, b3):
    """Pure-JAX reference with NCHW / OIHW semantics (matches PyTorch forward)."""
    def conv(h, w, pad):
        return jax.lax.conv_general_dilated(
            h, w, window_strides=(1, 1), padding=pad,
            dimension_numbers=("NCHW", "OIHW", "NCHW"))

    def bn(y, s, b):
        return y * s.reshape(1, -1, 1, 1) + b.reshape(1, -1, 1, 1)

    h = jax.nn.relu(bn(conv(x, w1_t, "VALID"), s1, b1))
    h = jax.nn.relu(bn(conv(h, w2_t, ((1, 1), (1, 1))), s2, b2))
    h = bn(conv(h, w3_t, "VALID"), s3, b3)
    return jax.nn.relu(h + x)   # identity shortcut


if __name__ == "__main__":
    key = jax.random.PRNGKey(0)
    k_x, k_p = jax.random.split(key)

    B, C, H, W = 2, 4, 16, 16        # in_planes == planes -> identity shortcut
    x = jax.random.normal(k_x, (B, C, H, W), jnp.float32)
    params, torch_params = init_params(k_p, C, C)

    out = bneck_forward(x, params)
    out = jax.block_until_ready(out)
    assert out.shape == (B, C, H, W)

    ref = bneck_reference(x, *torch_params)
    err = float(jnp.max(jnp.abs(out - ref)))
    if not err < 2e-2:
        raise AssertionError(f"kernel/reference mismatch, max abs err = {err}")

    print("KERNEL_OK")
</pallas_src>

<mosaic_0001>
module attributes {stable_mosaic.version = 11 : i64} {
  func.func @_bneck_kernel(%arg0: i32, %arg1: memref<1x4x256xf32, #tpu.memory_space<vmem>>, %arg2: memref<4x4xf32, #tpu.memory_space<vmem>>, %arg3: memref<4x1xf32, #tpu.memory_space<vmem>>, %arg4: memref<4x36xf32, #tpu.memory_space<vmem>>, %arg5: memref<4x1xf32, #tpu.memory_space<vmem>>, %arg6: memref<4x4xf32, #tpu.memory_space<vmem>>, %arg7: memref<4x1xf32, #tpu.memory_space<vmem>>, %arg8: memref<1x4x256xf32, #tpu.memory_space<vmem>>) attributes {dimension_semantics = [#tpu.dimension_semantics<parallel>], iteration_bounds = array<i64: 2>, scalar_prefetch = 0 : i64, scratch_operands = 0 : i64, tpu.core_type = #tpu.core_type<tc>, window_params = [{transform_indices = @transform_0, window_bounds = array<i64: 1, 4, 256>}, {pipeline_mode = #tpu.pipeline_mode<synchronous>, transform_indices = @transform_1, window_bounds = array<i64: 4, 4>}, {pipeline_mode = #tpu.pipeline_mode<synchronous>, transform_indices = @transform_2, window_bounds = array<i64: 4, 1>}, {pipeline_mode = #tpu.pipeline_mode<synchronous>, transform_indices = @transform_3, window_bounds = array<i64: 4, 36>}, {pipeline_mode = #tpu.pipeline_mode<synchronous>, transform_indices = @transform_4, window_bounds = array<i64: 4, 1>}, {pipeline_mode = #tpu.pipeline_mode<synchronous>, transform_indices = @transform_5, window_bounds = array<i64: 4, 4>}, {pipeline_mode = #tpu.pipeline_mode<synchronous>, transform_indices = @transform_6, window_bounds = array<i64: 4, 1>}, {transform_indices = @transform_7, window_bounds = array<i64: 1, 4, 256>}]} {
    %c0 = arith.constant 0 : index
    %c0_0 = arith.constant 0 : index
    %c0_1 = arith.constant 0 : index
    %0 = vector.load %arg1[%c0, %c0_0, %c0_1] : memref<1x4x256xf32, #tpu.memory_space<vmem>>, vector<1x4x256xf32>
    %1 = vector.shape_cast %0 : vector<1x4x256xf32> to vector<4x256xf32>
    %c0_2 = arith.constant 0 : index
    %c0_3 = arith.constant 0 : index
    %2 = vector.load %arg2[%c0_2, %c0_3] : memref<4x4xf32, #tpu.memory_space<vmem>>, vector<4x4xf32>
    %cst = arith.constant dense<0.000000e+00> : vector<4x256xf32>
    %3 = tpu.matmul %2, %1, %cst {dimension_numbers = #tpu.dot_dimension_numbers<[1], [0], [0], [1], [0, 0, 1, 1], [], []>} : vector<4x4xf32>, vector<4x256xf32>, vector<4x256xf32> -> vector<4x256xf32>
    %c0_4 = arith.constant 0 : index
    %c0_5 = arith.constant 0 : index
    %4 = vector.load %arg3[%c0_4, %c0_5] : memref<4x1xf32, #tpu.memory_space<vmem>>, vector<4x1xf32>
    %5 = vector.broadcast %4 : vector<4x1xf32> to vector<4x256xf32>
    %6 = arith.addf %3, %5 : vector<4x256xf32>
    %cst_6 = arith.constant 0.000000e+00 : f32
    %7 = vector.broadcast %cst_6 : f32 to vector<4x256xf32>
    %8 = arith.maximumf %6, %7 : vector<4x256xf32>
    %9 = tpu.iota {dimensions = array<i32: 1>} : vector<1x256xi32>
    %c16_i32 = arith.constant 16 : i32
    %c0_i32 = arith.constant 0 : i32
    %10 = arith.cmpi eq, %c16_i32, %c0_i32 : i32
    %c1_i32 = arith.constant 1 : i32
    %11 = arith.select %10, %c1_i32, %c16_i32 : i32
    %12 = vector.broadcast %11 : i32 to vector<1x256xi32>
    %13 = arith.remsi %9, %12 : vector<1x256xi32>
    %c0_i32_7 = arith.constant 0 : i32
    %14 = vector.broadcast %c0_i32_7 : i32 to vector<1x256xi32>
    %15 = arith.cmpi ne, %13, %14 : vector<1x256xi32>
    %c0_i32_8 = arith.constant 0 : i32
    %16 = vector.broadcast %c0_i32_8 : i32 to vector<1x256xi32>
    %17 = arith.cmpi slt, %13, %16 : vector<1x256xi32>
    %c0_i32_9 = arith.constant 0 : i32
    %18 = arith.cmpi slt, %11, %c0_i32_9 : i32
    %19 = vector.broadcast %18 : i1 to vector<1x256xi1>
    %20 = vector.broadcast %19 : vector<1x256xi1> to vector<1x256xi1>
    %21 = arith.xori %17, %20 : vector<1x256xi1>
    %22 = arith.andi %21, %15 : vector<1x256xi1>
    %23 = vector.broadcast %11 : i32 to vector<1x256xi32>
    %24 = arith.addi %13, %23 : vector<1x256xi32>
    %25 = arith.select %22, %24, %13 : vector<1x256xi1>, vector<1x256xi32>
    %c15_i32 = arith.constant 15 : i32
    %26 = vector.broadcast %c15_i32 : i32 to vector<1x256xi32>
    %27 = arith.cmpi eq, %25, %26 : vector<1x256xi32>
    %cst_10 = arith.constant 0.000000e+00 : f32
    %28 = vector.shape_cast %27 : vector<1x256xi1> to vector<1x256xi1>
    %29 = vector.broadcast %28 : vector<1x256xi1> to vector<4x256xi1>
    %30 = vector.broadcast %cst_10 : f32 to vector<4x256xf32>
    %31 = arith.select %29, %30, %8 : vector<4x256xi1>, vector<4x256xf32>
    %c0_i32_11 = arith.constant 0 : i32
    %32 = vector.broadcast %c0_i32_11 : i32 to vector<1x256xi32>
    %33 = arith.cmpi eq, %25, %32 : vector<1x256xi32>
    %cst_12 = arith.constant 0.000000e+00 : f32
    %34 = vector.shape_cast %33 : vector<1x256xi1> to vector<1x256xi1>
    %35 = vector.broadcast %34 : vector<1x256xi1> to vector<4x256xi1>
    %36 = vector.broadcast %cst_12 : f32 to vector<4x256xf32>
    %37 = arith.select %35, %36, %8 : vector<4x256xi1>, vector<4x256xf32>
    %cst_13 = arith.constant 0.000000e+00 : f32
    %38 = vector.broadcast %cst_13 : f32 to vector<4x17xf32>
    %39 = vector.extract_strided_slice %31 {offsets = [0, 0], sizes = [4, 239], strides = [1, 1]} : vector<4x256xf32> to vector<4x239xf32>
    %40 = tpu.concatenate %38, %39 in 1 : vector<4x17xf32>, vector<4x239xf32> -> vector<4x256xf32>
    %cst_14 = arith.constant 0.000000e+00 : f32
    %41 = vector.broadcast %cst_14 : f32 to vector<4x16xf32>
    %42 = vector.extract_strided_slice %8 {offsets = [0, 0], sizes = [4, 240], strides = [1, 1]} : vector<4x256xf32> to vector<4x240xf32>
    %43 = tpu.concatenate %41, %42 in 1 : vector<4x16xf32>, vector<4x240xf32> -> vector<4x256xf32>
    %cst_15 = arith.constant 0.000000e+00 : f32
    %44 = vector.broadcast %cst_15 : f32 to vector<4x15xf32>
    %45 = vector.extract_strided_slice %37 {offsets = [0, 0], sizes = [4, 241], strides = [1, 1]} : vector<4x256xf32> to vector<4x241xf32>
    %46 = tpu.concatenate %44, %45 in 1 : vector<4x15xf32>, vector<4x241xf32> -> vector<4x256xf32>
    %cst_16 = arith.constant 0.000000e+00 : f32
    %47 = vector.broadcast %cst_16 : f32 to vector<4x1xf32>
    %48 = vector.extract_strided_slice %31 {offsets = [0, 0], sizes = [4, 255], strides = [1, 1]} : vector<4x256xf32> to vector<4x255xf32>
    %49 = tpu.concatenate %47, %48 in 1 : vector<4x1xf32>, vector<4x255xf32> -> vector<4x256xf32>
    %cst_17 = arith.constant 0.000000e+00 : f32
    %50 = vector.broadcast %cst_17 : f32 to vector<4x1xf32>
    %51 = vector.extract_strided_slice %37 {offsets = [0, 1], sizes = [4, 255], strides = [1, 1]} : vector<4x256xf32> to vector<4x255xf32>
    %52 = tpu.concatenate %51, %50 in 1 : vector<4x255xf32>, vector<4x1xf32> -> vector<4x256xf32>
    %cst_18 = arith.constant 0.000000e+00 : f32
    %53 = vector.broadcast %cst_18 : f32 to vector<4x15xf32>
    %54 = vector.extract_strided_slice %31 {offsets = [0, 15], sizes = [4, 241], strides = [1, 1]} : vector<4x256xf32> to vector<4x241xf32>
    %55 = tpu.concatenate %54, %53 in 1 : vector<4x241xf32>, vector<4x15xf32> -> vector<4x256xf32>
    %cst_19 = arith.constant 0.000000e+00 : f32
    %56 = vector.broadcast %cst_19 : f32 to vector<4x16xf32>
    %57 = vector.extract_strided_slice %8 {offsets = [0, 16], sizes = [4, 240], strides = [1, 1]} : vector<4x256xf32> to vector<4x240xf32>
    %58 = tpu.concatenate %57, %56 in 1 : vector<4x240xf32>, vector<4x16xf32> -> vector<4x256xf32>
    %cst_20 = arith.constant 0.000000e+00 : f32
    %59 = vector.broadcast %cst_20 : f32 to vector<4x17xf32>
    %60 = vector.extract_strided_slice %37 {offsets = [0, 17], sizes = [4, 239], strides = [1, 1]} : vector<4x256xf32> to vector<4x239xf32>
    %61 = tpu.concatenate %60, %59 in 1 : vector<4x239xf32>, vector<4x17xf32> -> vector<4x256xf32>
    %62 = tpu.concatenate %40, %43, %46, %49, %8, %52, %55, %58, %61 in 0 : vector<4x256xf32>, vector<4x256xf32>, vector<4x256xf32>, vector<4x256xf32>, vector<4x256xf32>, vector<4x256xf32>, vector<4x256xf32>, vector<4x256xf32>, vector<4x256xf32> -> vector<36x256xf32>
    %c0_21 = arith.constant 0 : index
    %c0_22 = arith.constant 0 : index
    %63 = vector.load %arg4[%c0_21, %c0_22] : memref<4x36xf32, #tpu.memory_space<vmem>>, vector<4x36xf32>
    %cst_23 = arith.constant dense<0.000000e+00> : vector<4x256xf32>
    %64 = tpu.matmul %63, %62, %cst_23 {dimension_numbers = #tpu.dot_dimension_numbers<[1], [0], [0], [1], [0, 0, 1, 1], [], []>} : vector<4x36xf32>, vector<36x256xf32>, vector<4x256xf32> -> vector<4x256xf32>
    %c0_24 = arith.constant 0 : index
    %c0_25 = arith.constant 0 : index
    %65 = vector.load %arg5[%c0_24, %c0_25] : memref<4x1xf32, #tpu.memory_space<vmem>>, vector<4x1xf32>
    %66 = vector.broadcast %65 : vector<4x1xf32> to vector<4x256xf32>
    %67 = arith.addf %64, %66 : vector<4x256xf32>
    %cst_26 = arith.constant 0.000000e+00 : f32
    %68 = vector.broadcast %cst_26 : f32 to vector<4x256xf32>
    %69 = arith.maximumf %67, %68 : vector<4x256xf32>
    %c0_27 = arith.constant 0 : index
    %c0_28 = arith.constant 0 : index
    %70 = vector.load %arg6[%c0_27, %c0_28] : memref<4x4xf32, #tpu.memory_space<vmem>>, vector<4x4xf32>
    %cst_29 = arith.constant dense<0.000000e+00> : vector<4x256xf32>
    %71 = tpu.matmul %70, %69, %cst_29 {dimension_numbers = #tpu.dot_dimension_numbers<[1], [0], [0], [1], [0, 0, 1, 1], [], []>} : vector<4x4xf32>, vector<4x256xf32>, vector<4x256xf32> -> vector<4x256xf32>
    %c0_30 = arith.constant 0 : index
    %c0_31 = arith.constant 0 : index
    %72 = vector.load %arg7[%c0_30, %c0_31] : memref<4x1xf32, #tpu.memory_space<vmem>>, vector<4x1xf32>
    %73 = vector.broadcast %72 : vector<4x1xf32> to vector<4x256xf32>
    %74 = arith.addf %71, %73 : vector<4x256xf32>
    %75 = arith.addf %74, %1 : vector<4x256xf32>
    %cst_32 = arith.constant 0.000000e+00 : f32
    %76 = vector.broadcast %cst_32 : f32 to vector<4x256xf32>
    %77 = arith.maximumf %75, %76 : vector<4x256xf32>
    %c0_33 = arith.constant 0 : index
    %c0_34 = arith.constant 0 : index
    %c0_35 = arith.constant 0 : index
    %78 = vector.load %arg8[%c0_33, %c0_34, %c0_35] : memref<1x4x256xf32, #tpu.memory_space<vmem>>, vector<1x4x256xf32>
    %79 = vector.shape_cast %78 : vector<1x4x256xf32> to vector<4x256xf32>
    %80 = vector.shape_cast %77 : vector<4x256xf32> to vector<1x4x256xf32>
    tpu.vector_store %arg8[%c0_33, %c0_34, %c0_35], %80 {strides = array<i32>} : memref<1x4x256xf32, #tpu.memory_space<vmem>>, vector<1x4x256xf32>,
    return
  }
  func.func @transform_0(%arg0: i32) -> (i32, i32, i32) {
    %c0_i32 = arith.constant 0 : i32
    %c0_i32_0 = arith.constant 0 : i32
    %c0_i32_1 = arith.constant 0 : i32
    return %arg0, %c0_i32, %c0_i32_0 : i32, i32, i32
  }
  func.func @transform_1(%arg0: i32) -> (i32, i32) {
    %c0_i32 = arith.constant 0 : i32
    %c0_i32_0 = arith.constant 0 : i32
    %c0_i32_1 = arith.constant 0 : i32
    return %c0_i32, %c0_i32_0 : i32, i32
  }
  func.func @transform_2(%arg0: i32) -> (i32, i32) {
    %c0_i32 = arith.constant 0 : i32
    %c0_i32_0 = arith.constant 0 : i32
    %c0_i32_1 = arith.constant 0 : i32
    return %c0_i32, %c0_i32_0 : i32, i32
  }
  func.func @transform_3(%arg0: i32) -> (i32, i32) {
    %c0_i32 = arith.constant 0 : i32
    %c0_i32_0 = arith.constant 0 : i32
    %c0_i32_1 = arith.constant 0 : i32
    return %c0_i32, %c0_i32_0 : i32, i32
  }
  func.func @transform_4(%arg0: i32) -> (i32, i32) {
    %c0_i32 = arith.constant 0 : i32
    %c0_i32_0 = arith.constant 0 : i32
    %c0_i32_1 = arith.constant 0 : i32
    return %c0_i32, %c0_i32_0 : i32, i32
  }
  func.func @transform_5(%arg0: i32) -> (i32, i32) {
    %c0_i32 = arith.constant 0 : i32
    %c0_i32_0 = arith.constant 0 : i32
    %c0_i32_1 = arith.constant 0 : i32
    return %c0_i32, %c0_i32_0 : i32, i32
  }
  func.func @transform_6(%arg0: i32) -> (i32, i32) {
    %c0_i32 = arith.constant 0 : i32
    %c0_i32_0 = arith.constant 0 : i32
    %c0_i32_1 = arith.constant 0 : i32
    return %c0_i32, %c0_i32_0 : i32, i32
  }
  func.func @transform_7(%arg0: i32) -> (i32, i32, i32) {
    %c0_i32 = arith.constant 0 : i32
    %c0_i32_0 = arith.constant 0 : i32
    %c0_i32_1 = arith.constant 0 : i32
    return %arg0, %c0_i32, %c0_i32_0 : i32, i32, i32
  }
}

</mosaic_0001>

<bundles_post_ra>
// kernel: tpu_custom_call.1
= control target key start
LH: loop header
LB: loop body
LE: loop exit
PB: predicated region body
PF: predicated region fallthrough
CT: control target
= control target key end

     0   :  { %12 = vsyncpa [#allocation3], 0  ;;  %s1310_s0 = inlined_call_operand.hbm [shape: f32[2,4,256], index: 0, kind: input, shape index: {}]   ;;  %s1311_s1 = inlined_call_operand.vmem [shape: f32[4,4], index: 1, kind: input, shape index: {}]   ;;  %s1312_s2 = inlined_call_operand.vmem [shape: f32[4,1], index: 2, kind: input, shape index: {}]   ;;  %s1313_s3 = inlined_call_operand.vmem [shape: f32[4,36], index: 3, kind: input, shape index: {}]   ;;  %s1314_s4 = inlined_call_operand.vmem [shape: f32[4,1], index: 4, kind: input, shape index: {}]   ;;  %s1315_s5 = inlined_call_operand.vmem [shape: f32[4,4], index: 5, kind: input, shape index: {}]   ;;  %s1316_s6 = inlined_call_operand.vmem [shape: f32[4,1], index: 6, kind: input, shape index: {}]   ;;  %s1317_s7 = inlined_call_operand.hbm [shape: f32[2,4,256], index: 7, kind: output, shape index: {}]  }
   0x1   :  { %14 = vsyncpa [#allocation3 + $0x1], 0 }
   0x2   :  { %15 = vsyncpa [#allocation4], 0 }
   0x3   :  { %17 = vsyncpa [#allocation4 + $0x1], 0  ;;  %s1079_s24 = smov 0   ;;  %s1081_s25 = smov 0  }
   0x4   :  { %s1083_s26 = smov 0   ;;  %s1085_s27 = smov 0  }
   0x5 LB: > { %s1100_s28 = sadd.s32 4294967295, %s1025_s27   ;;  %s802_s29 = sadd.s32 4294967294, %s1025_s27   ;;  %s1025_s27 = sphi %s1085_s27, %s1332_s27   ;;  %s1021_s26 = sphi %s1083_s26, %s1331_s26   ;;  %s1017_s25 = sphi %s1081_s25, %s1330_s25   ;;  %s1013_s24 = sphi %s1079_s24, %s1329_s24  }
   0x6   : > { %s1104_s30 = sadd.s32 1, %s1025_s27   ;;  %s30_s8 = sadd.s32 1, %s1021_s26 }
   0x7   : > { %s27_s9 = ssub.s32 %s1025_s27, %s1104_s30  ;;  %p37_p0 = scmp.ne.s32.totalorder %s1021_s26, %s1017_s25 }
   0x8   : > { %p28_p1 = scmp.eq.s32.totalorder %s27_s9, 0  ;;  %p38_p2 = scmp.eq.s32.totalorder %s1025_s27, 0 }
   0x9   : > { %p43_p3 = scmp.ne.s32.totalorder %s1017_s25, %s1013_s24  ;;  %p44_p4 = scmp.eq.s32.totalorder %s1100_s28, 0 }
   0xa   : > { %s1116_s10 = scalar_select %p28_p1, %s1021_s26, %s30_s8  }
   0xb   : > { %p1118_p5 = por %p38_p2, %p37_p0  ;;  %p1122_p6 = por %p44_p4, %p43_p3 }
   0xc   : > { %p193_p7 = scmp.eq.s32.totalorder %s1100_s28, 1  ;;  %p199_p8 = scmp.eq.s32.totalorder %s802_s29, 1 }
   0xd   : > { %p847_p10 = scmp.lt.s32.totalorder %s1025_s27, 2  ;;  %s237_s15 = sand.u32 1, %s1021_s26  }
   0xe   : > { %p1129_p11 = por %p193_p7, %p37_p0  ;;  %p1133_p12 = por %p199_p8, %p43_p3 }
   0xf   : > { %s825_s16 = sshll.u32 %s1025_s27, 7  ;;  %s805_s17 = sshll.u32 %s237_s15, 3 }
  0x10   : > { %s1321_s13 = scalar_select %p1129_p11, 1, 0 }
  0x11   : > { %s1322_s14 = scalar_select %p1133_p12, 1, 0 }
  0x12   : > { %s1142_s20 = scalar_lea.hbm %s1310_s0, %s825_s16  ;;  %s241_s21 = scalar_lea.vmem [#allocation2], %s805_s17 }
  0x13   : > { %s249_s22 = sshll.u32 %s241_s21, 4  ;;  %p1146_p13 = pnand %p847_p10, %p1118_p5  ;;  %s1150_s22 = int_to_ptr.vmem [resolvable:$true] %s249_s22 }
  0x14   : > { %s238_s29 = scalar_lea.sflag [#allocation3], %s237_s15  ;;  %s929_s8 = scalar_lea.hbm %s1142_s20, 128 }
  0x15   : > { %p930_p2 = scmp.ne.s32.totalorder %s1142_s20, %s929_s8  ;;  %p931_p3 = pneg %p1146_p13 }
  0x16   : > { %s934_s16 = scalar_lea.hbm %s1310_s0, 256  ;;  %p935_p5 = scmp.lt.u32.totalorder %s1142_s20, %s1310_s0 }
  0x17   : > { %p932_p4 = pnand %p931_p3, %p930_p2  ;;  %p936_p8 = scmp.lt.u32.totalorder %s934_s16, %s929_s8 }
  0x18   : > { %p938_p9 = scmp.lt.u32.totalorder %s929_s8, %s1142_s20 }
  0x19   : > { %p933_p7 = pneg %p932_p4  ;;  %p937_p10 = por %p936_p8, %p935_p5 }
  0x1b   : > { %p939_p0 = por %p938_p9, %p937_p10 }
  0x1d   : > { %p940_p1 = pnand %p939_p0, %p933_p7 }
  0x1f   : > { %943 = shalt.err (!%p940_p1)
}
  0x20   : > { %s944_s15 = scalar_lea.vmem %s1150_s22, 128  ;;  %s1027_s19 = smov [#allocation2]  }
  0x21   : > { %p945_p2 = scmp.ne.s32.totalorder %s1150_s22, %s944_s15  ;;  %s949_s21 = sshll.u32 %s1027_s19, 4  ;;  %s950_s21 = int_to_ptr.vmem [resolvable:$false] %s949_s21 }
  0x22   : > { %s951_s9 = scalar_lea.vmem %s950_s21, 256  ;;  %p952_p11 = scmp.lt.s32.totalorder %s1150_s22, %s950_s21 }
  0x23   : > { %p947_p4 = pnand %p945_p2, %p931_p3  ;;  %p953_p5 = scmp.lt.s32.totalorder %s951_s9, %s944_s15 }
  0x25   : > { %p948_p12 = pneg %p947_p4  ;;  %p954_p8 = por %p953_p5, %p952_p11 }
  0x27   : > { %p955_p9 = pnand %p954_p8, %p948_p12 }
  0x29   : > { %958 = shalt.err (!%p955_p9)
}
  0x2a   : > { %842 = dma.hbm_to_vmem [thread:$0]  (!%p1146_p13), %s1142_s20, 128, %s1150_s22, %s238_s29  }
  0x2b   : > { %p1324_p0 = scmp.lt.s32.totalorder %s1025_s27, 3  ;;  %p1325_p1 = scmp.ge.s32.totalorder %s1025_s27, 1 }
  0x2d   : > { %p255_p3 = pnand %p1325_p1, %p1324_p0 }
  0x2e   : > { %s1184_s8 = sand.u32 (!%p255_p3), 1, %s1017_s25  }
  0x2f   : > { %258 = sbr.rel (%p255_p3) target bundleno = 873 (0x369), region = 48  ;;  %s809_s11 = sshll.u32 (!%p255_p3), %s1184_s8, 3 }
  0x30   : > { %s261_s16 = scalar_lea.sflag (!%p255_p3), [#allocation3], %s1184_s8  ;;  %s264_s23 = scalar_lea.vmem (!%p255_p3), [#allocation2], %s809_s11 }
  0x36   : > { %1004 = dma.done.wait (%p1122_p6), %s261_s16, 128  }
  0x37   : > { %1006 = vsyncadd (%p1122_p6), %s261_s16, 4294967168  ;;  %v1028_v0 = vmov 0.0   ;;  %v1029_v1 = vmov 0   ;;  %v1194_v2 = vld [vmem:[%s264_s23] sm:$0xff]  ;;  %vm309_vm0 = vcmask 1043456   ;;  %vm305_vm1 = vcmask 31744  }
  0x38   : > { %378 = vmatprep.mubr.f32.mxu0 %v1028_v0  ;;  %891 = vset.pattern.permute.xlu0 %v1029_v1  ;;  %v297_v3 = vld [vmem:[%s1312_s2] sm:$0xf]  ;;  %v1201_v4 = vcombine.high %v1194_v2, %v1194_v2  ;;  %v387_v6 = vlaneseq  ;;  %s1030_s17 = smov 16   ;;  %s1031_s18 = smov 1   ;;  %vm447_vm6 = vcmask 130048   ;;  %vm466_vm7 = vcmask 7168  }
  0x39   : > { %611 = vmatprep.mubr.f32.mxu1 %v1028_v0  ;;  %927 = vset.pattern.permute.xlu1 %v1029_v1  ;;  %v296_v5 = vld [vmem:[%s1311_s1] sm:$0xf]  ;;  %s1032_s15 = smov 15   ;;  %s1033_s19 = smov 17   ;;  %vm457_vm8 = vcmask 121856   ;;  %vm436_vm9 = vcmask 138240  }
  0x3a   : > { %300 = vperm.xlu0 %891, %v297_v3   ;;  %811 = vmatprep.subr.msk.mxu0 %vm309_vm0, %v1201_v4  ;;  %v388_v7 = vand.u32 127, %v387_v6  ;;  %s1034_s21 = smov 112   ;;  %s1035_s9 = smov 127   ;;  %v532_v28 = vld [vmem:[%s1314_s4] sm:$0xf]  ;;  %vm491_vm10 = vcmask 916480  }
  0x3b   : > { %812 = vmatpush1.msk.msra.mxu0 %vm309_vm0, %v1194_v2  ;;  %s1036_s16 = smov 111   ;;  %s1037_s23 = smov 113   ;;  %vm474_vm11 = vcmask 1039360   ;;  %vm482_vm12 = vcmask 924672   ;;  %vm499_vm13 = vcmask 908288   ;;  %vm538_vm14 = vcmask 293888  }
  0x3c   : > { %813 = vmatmul.mubr.msk.f32.vlgmr.msra.gmra.mrb[0].mxu0 %vm305_vm1, %v296_v5  ;;  %v389_v8 = vadd.s32 128, %v388_v7  ;;  %v394_v10 = vand.u32 15, %v388_v7  ;;  %s718_s12 = scalar_lea.sflag [#allocation4], %s1184_s8  ;;  %p1326_p11 = scmp.ne.s32.totalorder %s1321_s13, 0 }
  0x3d   : > { %700 = vmatprep.mubr.f32.mxu0 %v1028_v0 }
  0x3e   : > { %v401_v11 = vand.u32 15, %v389_v8  ;;  %vm414_vm2 = vcmp.eq.s32.totalorder %v394_v10, 15  ;;  %vm422_vm4 = vcmp.eq.s32.totalorder %v394_v10, 0 }
  0x40   : > { %vm415_vm3 = vcmp.eq.s32.totalorder %v401_v11, 15  ;;  %vm423_vm5 = vcmp.eq.s32.totalorder %v401_v11, 0 }
  0xb9   : > { %v301_v9 = vpop.permute.xlu0 %300 }
 0x10f   : > { %v380_v12 = vpop.f32.mrb[0].mxu0 }
 0x110   : > { %v381_v13 = vadd.f32 %v380_v12, %v301_v9  ;;  %v382_v14 = vpop.f32.mrb[1].mxu0 }
 0x111   : > { %v383_v15 = vadd.f32 %v382_v14, %v301_v9 }
 0x112   : > { %v1211_v16 = vmax.f32 %v381_v13, 0.0 }
 0x113   : > { %v1213_v17 = vmax.f32 %v383_v15, 0.0 }
 0x114   : > { %v420_v18 = vsel %vm414_vm2, 0.0, %v1211_v16  ;;  %v428_v22 = vsel %vm422_vm4, 0.0, %v1211_v16 }
 0x115   : > { %v892_v19 = vpack.i.bf16 %v1213_v17, %v1211_v16  ;;  %v421_v20 = vsel %vm415_vm3, 0.0, %v1213_v17  ;;  %v429_v23 = vsel %vm423_vm5, 0.0, %v1213_v17  ;;  %v912_v25 = vpack.i.bf16 %v1211_v16, %v1213_v17 }
 0x116   : > { %v897_v21 = vpack.i.bf16 %v421_v20, %v420_v18  ;;  %v907_v24 = vpack.i.bf16 %v429_v23, %v428_v22  ;;  %v917_v26 = vpack.i.bf16 %v428_v22, %v429_v23  ;;  %v922_v27 = vpack.i.bf16 %v420_v18, %v421_v20 }
 0x117   : > { %893 = vrot.lane.b32.xlu0 %v892_v19, %s1030_s17 }
 0x118   : > { %898 = vrot.lane.b32.xlu1 %v897_v21, %s1031_s18 }
 0x11b   : > { %908 = vrot.lane.b32.xlu0 %v907_v24, %s1032_s15 }
 0x11c   : > { %903 = vrot.lane.b32.xlu1 %v897_v21, %s1033_s19 }
 0x11f   : > { %913 = vrot.lane.b32.xlu0 %v912_v25, %s1034_s21  ;;  %s826_s21 = sshll.u32 %s1100_s28, 7  ;;  %s1038_s28 = smov [#allocation5]  }
 0x120   : > { %918 = vrot.lane.b32.xlu1 %v917_v26, %s1035_s9  ;;  %s294_s9 = scalar_lea.vmem [#allocation5], %s809_s11  ;;  %s1266_s22 = scalar_lea.hbm %s1317_s7, %s826_s21 }
 0x121   : > { %s963_s11 = sshll.u32 %s1038_s28, 4  ;;  %s964_s11 = int_to_ptr.vmem [resolvable:$false] %s963_s11 }
 0x122   : > { %s965_s17 = scalar_lea.vmem %s964_s11, 256 }
 0x123   : > { %497 = vrot.lane.b32.xlu0 %v429_v23, %s1036_s16 }
 0x124   : > { %923 = vrot.lane.b32.xlu1 %v922_v27, %s1037_s23 }
 0x127   : > { %535 = vperm.xlu0 %891, %v532_v28  }
 0x128   : > { %495 = vrot.lane.b32.xlu1 %v428_v22, %s1036_s16  ;;  %s732_s16 = sshll.u32 %s294_s9, 4  ;;  %s1268_s16 = int_to_ptr.vmem [resolvable:$true] %s732_s16 }
 0x129   : > { %s959_s29 = scalar_lea.vmem %s1268_s16, 128  ;;  %p966_p7 = scmp.lt.s32.totalorder %s1268_s16, %s964_s11 }
 0x12a   : > { %p960_p6 = scmp.ne.s32.totalorder %s1268_s16, %s959_s29  ;;  %p967_p10 = scmp.lt.s32.totalorder %s965_s17, %s959_s29 }
 0x12c   : > { %p961_p12 = pnand %p960_p6, %p1326_p11  ;;  %p968_p2 = por %p967_p10, %p966_p7 }
 0x12e   : > { %p962_p13 = pneg %p961_p12 }
 0x130   : > { %p969_p4 = pnand %p968_p2, %p962_p13 }
 0x189   : > { %v894_v29 = vpop.permute.xlu0 %893 }
 0x18a   : > { %v896_v30 = vunpack.i.h.bf16 %v894_v29  ;;  %v895_v31 = vunpack.i.l.bf16 %v894_v29  ;;  %v899_v32 = vpop.permute.xlu1 %898 }
 0x18b   : > { %v901_v33 = vunpack.i.h.bf16 %v899_v32  ;;  %v900_v34 = vunpack.i.l.bf16 %v899_v32 }
 0x18c   : > { %v450_v35 = vsel %vm447_vm6, 0.0, %v895_v31  ;;  %v448_v38 = vsel %vm447_vm6, %v895_v31, %v896_v30 }
 0x18d   : > { %v469_v36 = vsel %vm466_vm7, 0.0, %v900_v34  ;;  %v909_v37 = vpop.permute.xlu0 %908  ;;  %v467_v39 = vsel %vm466_vm7, %v900_v34, %v901_v33  ;;  %v504_v47 = vrot.slane %v450_v35, 4  ;;  %v505_v50 = vrot.slane %v448_v38, 4  ;;  %v620_v35 = vld [vmem:[%s1315_s5] sm:$0xf] }
 0x18e   : > { %v509_v40 = vrot.slane %v469_v36, 4  ;;  %v911_v41 = vunpack.i.h.bf16 %v909_v37  ;;  %v910_v42 = vunpack.i.l.bf16 %v909_v37  ;;  %v904_v43 = vpop.permute.xlu1 %903  ;;  %v510_v44 = vrot.slane %v467_v39, 4 }
 0x18f   : > { %v906_v45 = vunpack.i.h.bf16 %v904_v43  ;;  %v905_v46 = vunpack.i.l.bf16 %v904_v43 }
 0x190   : > { %v461_v48 = vsel %vm457_vm8, 0.0, %v910_v42  ;;  %v458_v49 = vsel %vm457_vm8, %v910_v42, %v911_v41 }
 0x191   : > { %v440_v51 = vsel %vm436_vm9, 0.0, %v905_v46  ;;  %v914_v52 = vpop.permute.xlu0 %913  ;;  %v437_v53 = vsel %vm436_vm9, %v905_v46, %v906_v45  ;;  %v526_v54 = vsel %vm309_vm0, %v458_v49, %v510_v44  ;;  %v525_v55 = vsel %vm309_vm0, %v461_v48, %v509_v40 }
 0x192   : > { %v916_v56 = vunpack.i.h.bf16 %v914_v52  ;;  %v915_v57 = vunpack.i.l.bf16 %v914_v52  ;;  %v919_v58 = vpop.permute.xlu1 %918  ;;  %v524_v59 = vsel %vm309_vm0, %v437_v53, %v505_v50  ;;  %v523_v60 = vsel %vm309_vm0, %v440_v51, %v504_v47 }
 0x193   : > { %v921_v61 = vunpack.i.h.bf16 %v919_v58  ;;  %v920_v62 = vunpack.i.l.bf16 %v919_v58  ;;  %v827_v63 = vpack.c.bf16 %v526_v54, %v524_v59  ;;  %v829_v0 = vpack.c.bf16 %v525_v55, %v523_v60 }
 0x194   : > { %v492_v1 = vsel %vm491_vm10, %v916_v56, %v915_v57  ;;  %v494_v3 = vsel %vm491_vm10, %v915_v57, 0.0 }
 0x195   : > { %v475_v5 = vsel %vm474_vm11, %v921_v61, %v920_v62  ;;  %v477_v6 = vsel %vm474_vm11, %v920_v62, 0.0  ;;  %828 = vmatprep.subr.bf16.mxu1 %v827_v63  ;;  %v519_v12 = vrot.slane %v492_v1, 4  ;;  %v520_v13 = vrot.slane %v494_v3, 4  ;;  %v498_v22 = vpop.permute.xlu0 %497 }
 0x196   : > { %v514_v7 = vrot.slane %v475_v5, 4  ;;  %v515_v8 = vrot.slane %v477_v6, 4  ;;  %v924_v9 = vpop.permute.xlu1 %923  ;;  %830 = vmatpush1.bf16.msra.mxu1 %v829_v0  ;;  %v502_v25 = vsel %vm499_vm13, %v498_v22, 0.0 }
 0x197   : > { %v926_v10 = vunpack.i.h.bf16 %v924_v9  ;;  %v925_v11 = vunpack.i.l.bf16 %v924_v9 }
 0x198   : > { %v528_v18 = vsel %vm309_vm0, %v1213_v17, %v515_v8  ;;  %v527_v20 = vsel %vm309_vm0, %v1211_v16, %v514_v7  ;;  %v531_v17 = vld [vmem:[%s1313_s3] sm:$0xf] }
 0x199   : > { %v483_v14 = vsel %vm482_vm12, %v926_v10, %v925_v11  ;;  %v486_v15 = vsel %vm482_vm12, %v925_v11, 0.0  ;;  %v621_v16 = vld [vmem:[%s1316_s6] sm:$0xf] }
 0x19a   : > { %v530_v19 = vsel %vm309_vm0, %v486_v15, %v520_v13  ;;  %v529_v21 = vsel %vm309_vm0, %v483_v14, %v519_v12  ;;  %v496_v26 = vpop.permute.xlu1 %495  ;;  %624 = vperm.xlu1 %927, %v621_v16  }
 0x19b   : > { %v831_v23 = vpack.c.bf16 %v530_v19, %v528_v18  ;;  %v833_v24 = vpack.c.bf16 %v529_v21, %v527_v20  ;;  %v500_v27 = vsel %vm499_vm13, %v496_v26, %v498_v22 }
 0x19d   : > { %832 = vmatprep.subr.bf16.mxu1 %v831_v23 }
 0x19e   : > { %834 = vmatpush1.bf16.msra.mxu1 %v833_v24 }
 0x19f   : > { %814 = vmatprep.subr.msk.mxu1 %vm309_vm0, %v502_v25 }
 0x1a2   : > { %815 = vmatpush1.msk.msra.mxu1 %vm309_vm0, %v500_v27 }
 0x1a3   : > { %816 = vmatmul.mubr.msk.f32.vlgmr.msra.gmra.mrb[0].mxu1 %vm538_vm14, %v531_v17 }
 0x1a6   : > { %v536_v28 = vpop.permute.xlu0 %535 }
 0x219   : > { %v625_v36 = vpop.permute.xlu1 %624 }
 0x276   : > { %v613_v29 = vpop.f32.mrb[0].mxu1 }
 0x277   : > { %v614_v30 = vadd.f32 %v613_v29, %v536_v28  ;;  %v615_v31 = vpop.f32.mrb[1].mxu1 }
 0x278   : > { %v616_v32 = vadd.f32 %v615_v31, %v536_v28 }
 0x279   : > { %v618_v34 = vmax.f32 %v614_v30, 0.0 }
 0x27a   : > { %v619_v33 = vmax.f32 %v616_v32, 0.0 }
 0x27c   : > { %817 = vmatprep.subr.msk.mxu0 %vm309_vm0, %v619_v33 }
 0x27d   : > { %818 = vmatpush1.msk.msra.mxu0 %vm309_vm0, %v618_v34 }
 0x27e   : > { %819 = vmatmul.mubr.msk.f32.vlgmr.msra.gmra.mrb[2].mxu0 %vm305_vm1, %v620_v35 }
 0x351   : > { %v702_v37 = vpop.f32.mrb[2].mxu0 }
 0x352   : > { %v703_v38 = vadd.f32 %v702_v37, %v625_v36  ;;  %v704_v39 = vpop.f32.mrb[3].mxu0 }
 0x353   : > { %v705_v40 = vadd.f32 %v704_v39, %v625_v36 }
 0x354   : > { %v708_v41 = vadd.f32 %v703_v38, %v1194_v2 }
 0x355   : > { %v709_v42 = vadd.f32 %v705_v40, %v1201_v4 }
 0x356   : > { %v710_v43 = vmax.f32 %v708_v41, 0.0 }
 0x357   : > { %v711_v44 = vmax.f32 %v709_v42, 0.0 }
 0x359   : > { %v714_v45 = vcombine.low %v710_v43, %v711_v44 }
 0x35b   : > { %716 = vst [vmem:[%s294_s9] sm:$0xff] %v714_v45 }
 0x35c   : > { %972 = shalt.err (!%p969_p4)
}
 0x35d   : > { %s973_s8 = scalar_lea.hbm %s1266_s22, 128  ;;  %s977_s19 = scalar_lea.hbm %s1317_s7, 256 }
 0x35e   : > { %p974_p5 = scmp.ne.s32.totalorder %s1266_s22, %s973_s8  ;;  %p978_p0 = scmp.lt.u32.totalorder %s1266_s22, %s1317_s7 }
 0x35f   : > { %p979_p1 = scmp.lt.u32.totalorder %s977_s19, %s973_s8  ;;  %p981_p6 = scmp.lt.u32.totalorder %s973_s8, %s1266_s22 }
 0x360   : > { %p975_p8 = pnand %p974_p5, %p1326_p11 }
 0x361   : > { %p980_p3 = por %p979_p1, %p978_p0 }
 0x362   : > { %p976_p9 = pneg %p975_p8 }
 0x363   : > { %p982_p12 = por %p981_p6, %p980_p3 }
 0x365   : > { %p983_p13 = pnand %p982_p12, %p976_p9 }
 0x367   : > { %986 = shalt.err (!%p983_p13)
}
 0x368   : > { %837 = dma.vmem_to_hbm [thread:$0]  (%p1326_p11), %s1268_s16, 128, %s1266_s22, %s718_s12  }
 0x369 PF: > { %s744_s23 = sand.u32 1, %s1013_s24   ;;  %p1327_p7 = scmp.ne.s32.totalorder %s1322_s14, 0 }
 0x36a   : > { %p1328_p10 = scmp.ge.s32.totalorder %s1025_s27, 2  ;;  %s745_s20 = scalar_lea.sflag [#allocation4], %s744_s23 }
 0x36c   : > { %p844_p2 = pnand %p1328_p10, %p1327_p7 }
 0x36e   : > { %1008 = dma.done.wait (!%p844_p2), %s745_s20, 128  }
 0x36f   : > { %1010 = vsyncadd (!%p844_p2), %s745_s20, 4294967168  ;;  %p20_p4 = scmp.ge.s32.totalorder %s1104_s30, 4   ;;  %s1329_s24 = smov %s1017_s25 }
 0x370   : > { %s1330_s25 = smov %s1021_s26  ;;  %s1331_s26 = smov %s1116_s10 }
 0x371   : > { %s1332_s27 = smov %s1104_s30  ;;  %22 = sbr.rel (!%p20_p4) target bundleno = 5 (0x5), region = 93 }
 0x378   :  { %750 = vsyncpa [#allocation3], 1 }
 0x379   :  { %752 = vsyncpa [#allocation3 + $0x1], 1 }
 0x37a   :  { %753 = vsyncpa [#allocation4], 1 }
 0x37b   :  { %755 = vsyncpa [#allocation4 + $0x1], 1 }

</bundles_post_ra>
